<compile_context>
chip_gen: v6e
topology: v6e:2x2x1
jax: 0.10.0
libtpu: 0.0.40
codegen_flags: <defaults>
</compile_context>

<pallas_src>
import jax
import jax.numpy as jnp
from jax.experimental import pallas as pl
from jax.experimental.pallas import tpu as pltpu


def _round_up(n, m):
    return ((n + m - 1) // m) * m


def _vmem_budget_and_limit():
    """Generation-aware (budget, vmem_limit) in bytes."""
    cap = None
    try:
        info = pltpu.get_tpu_info()
        cap = getattr(info, "vmem_capacity_bytes", None)
    except Exception:
        cap = None
    if cap is None:
        cap = 64 * 1024 * 1024            # assume the smallest (v7x-like) part
    if cap >= 128 * 1024 * 1024:          # v5e / v6e: 128 MiB VMEM
        return 80 * 1024 * 1024, 100 * 1024 * 1024
    return 20 * 1024 * 1024, 30 * 1024 * 1024   # v7x: 64 MiB phys / 32 scoped


def _vmem_bytes_per_step(tb, S, H, Ap, in_itemsize):
    """Conservative per-grid-step VMEM footprint using lane-padded widths."""
    Hp = _round_up(H, 128)                # H lanes pad to 128 in VMEM
    Sp = _round_up(S, 8)                  # sublane padding of the x tile
    Sl = _round_up(S, 128)                # lane padding of (TB, S) arrays
    x_bufs = 2 * tb * Sp * Hp * in_itemsize          # double-buffered x tile
    weights = 2 * (_round_up(H, 8) * Ap * in_itemsize + 2 * 8 * Ap * 4)
    proj = 2 * tb * Ap * 4                            # v_s and v_s*u (f32)
    scores = 3 * tb * Sl * 4                          # vu / exps / alphas
    wsum = 2 * tb * Hp * 4                            # accumulator + product
    outs = 2 * tb * Hp * 4 + 2 * tb * Sl * 4          # double-buffered outputs
    return x_bufs + weights + proj + scores + wsum + outs


def _pick_tiling(B, S, H, Ap, in_itemsize, budget):
    """Pick (tile, num_steps, padded_batch).

    The tile is a multiple of 8, fits the VMEM budget, and (when the padded
    batch allows it) yields at least 2 grid steps so the "parallel" grid axis
    can shard across v7x's two TensorCores.  Tiles are balanced so host-side
    batch padding is < one tile."""
    B8 = _round_up(max(B, 1), 8)
    tb_max = 8
    cand = 16
    while cand <= B8 and _vmem_bytes_per_step(cand, S, H, Ap, in_itemsize) <= budget:
        tb_max = cand
        cand += 8
    tb_max = min(tb_max, B8)
    min_steps = 2 if B8 >= 16 else 1
    num_steps = max(min_steps, -(-B8 // tb_max))
    tb = _round_up(-(-B8 // num_steps), 8)     # <= tb_max by construction
    return tb, num_steps, tb * num_steps


def _attention_kernel(x_ref, w_ref, b_ref, u_ref, out_ref, *alphas_refs):
    # x_ref: (TB, S, H)  input dtype (f32 or bf16)
    # w_ref: (H, Ap)     input dtype
    # b_ref: (1, Ap)     f32
    # u_ref: (1, Ap)     f32 (zero-padded lanes beyond the true attention size)
    # out_ref: (TB, H)   f32
    # alphas_refs: ()    or ((TB, S) f32,)
    TB, S, H = x_ref.shape
    w = w_ref[...]
    b = b_ref[...]
    u = u_ref[...]

    # Per-sequence-step projection + score.  Working on (TB, H) slices avoids
    # the (TB*S, H) fold relayout.  MXU matmul with f32 accumulation; the N=1
    # v @ u product is a VPU multiply + lane reduce (padded u lanes are zero).
    vu_cols = []
    for s in range(S):                                            # S is small/static
        xs = x_ref[:, s, :]                                       # (TB, H)
        v_s = jnp.tanh(
            jnp.dot(xs, w, preferred_element_type=jnp.float32) + b)   # (TB, Ap)
        vu_cols.append(jnp.sum(v_s * u, axis=-1, keepdims=True))      # (TB, 1)
    vu = jnp.concatenate(vu_cols, axis=1)                             # (TB, S)

    # Softmax over the sequence axis (max-subtraction is mathematically
    # identical to the PyTorch exp/sum form, numerically safer).
    vu = vu - jnp.max(vu, axis=1, keepdims=True)
    exps = jnp.exp(vu)
    alphas = exps / jnp.sum(exps, axis=1, keepdims=True)              # (TB, S) f32

    # Weighted reduction over seq, accumulated per step: never materializes a
    # (TB, S, H) f32 temporary; the multiply promotes bf16 x to f32.
    acc = jnp.zeros((TB, H), jnp.float32)
    for s in range(S):
        acc = acc + x_ref[:, s, :] * alphas[:, s:s + 1]
    out_ref[...] = acc.astype(out_ref.dtype)

    for a_ref in alphas_refs:                                        # only when r_alphas
        a_ref[...] = alphas.astype(a_ref.dtype)


def attention_layer(x, W_omega, b_omega, u_omega, r_alphas=False, *,
                    compute_dtype=None):
    """Pallas implementation of AttentionLayer.forward.

    compute_dtype: optional dtype (e.g. jnp.bfloat16) for the streamed / MXU
    operands (x, W_omega); accumulation and the softmax stay in f32.  bf16 is
    recommended for bandwidth-bound deployment; the f32 default matches the
    PyTorch module's numerics exactly.
    """
    B, S, H = x.shape
    A = W_omega.shape[-1]

    # Lane-pad the attention dim to a multiple of 128 (exact: padded u lanes
    # contribute tanh(b_pad)*0 = 0 to vu).
    Ap = _round_up(A, 128)
    pad_a = Ap - A
    Wp = jnp.pad(W_omega.astype(jnp.float32), ((0, 0), (0, pad_a)))
    bp = jnp.pad(b_omega.astype(jnp.float32).reshape(1, A), ((0, 0), (0, pad_a)))
    up = jnp.pad(u_omega.astype(jnp.float32).reshape(1, A), ((0, 0), (0, pad_a)))

    in_dtype = jnp.dtype(compute_dtype) if compute_dtype is not None else jnp.dtype(x.dtype)
    w_in = Wp.astype(in_dtype)

    budget, vmem_limit = _vmem_budget_and_limit()
    TB, num_steps, B_pad = _pick_tiling(B, S, H, Ap, in_dtype.itemsize, budget)

    # Host-side batch padding (zero rows are numerically safe and sliced off).
    x_in = x.astype(in_dtype)
    if B_pad > B:
        x_in = jnp.pad(x_in, ((0, B_pad - B), (0, 0), (0, 0)))

    grid = (num_steps,)
    in_specs = [
        pl.BlockSpec((TB, S, H), lambda i: (i, 0, 0)),   # x: tiled over batch
        pl.BlockSpec((H, Ap), lambda i: (0, 0)),         # W: resident
        pl.BlockSpec((1, Ap), lambda i: (0, 0)),         # b: resident
        pl.BlockSpec((1, Ap), lambda i: (0, 0)),         # u: resident
    ]

    if r_alphas:
        out_shape = (jax.ShapeDtypeStruct((B_pad, H), jnp.float32),
                     jax.ShapeDtypeStruct((B_pad, S), jnp.float32))
        out_specs = (pl.BlockSpec((TB, H), lambda i: (i, 0)),
                     pl.BlockSpec((TB, S), lambda i: (i, 0)))
        out_bytes = B_pad * (H + S) * 4
    else:
        out_shape = jax.ShapeDtypeStruct((B_pad, H), jnp.float32)
        out_specs = pl.BlockSpec((TB, H), lambda i: (i, 0))
        out_bytes = B_pad * H * 4

    cost = pl.CostEstimate(
        flops=2 * B_pad * S * H * Ap + 2 * B_pad * S * Ap + 2 * B_pad * S * H,
        transcendentals=B_pad * S * (Ap + 1),
        bytes_accessed=B_pad * S * H * in_dtype.itemsize
                       + (H + 2) * Ap * 4 + out_bytes,
    )

    result = pl.pallas_call(
        _attention_kernel,
        out_shape=out_shape,
        grid=grid,
        in_specs=in_specs,
        out_specs=out_specs,
        compiler_params=pltpu.CompilerParams(
            dimension_semantics=("parallel",),
            vmem_limit_bytes=vmem_limit,
        ),
        cost_estimate=cost,
    )(x_in, w_in, bp, up)

    if r_alphas:
        out, alphas = result
        return out[:B], alphas[:B]
    return result[:B]


def _reference(x, W, b, u):
    # Pure-JAX reference mirroring the PyTorch forward, for validation.
    B, S, H = x.shape
    v = jnp.tanh(x.reshape(B * S, H) @ W + b[None, :])
    vu = v @ u.reshape(-1, 1)
    exps = jnp.exp(vu).reshape(B, S)
    alphas = exps / jnp.sum(exps, axis=1, keepdims=True)
    out = jnp.sum(x * alphas[:, :, None], axis=1)
    return out, alphas


if __name__ == "__main__":
    # Small shapes consistent with the module: batch=2, seq=8, hidden=32,
    # attention_size=32.
    B, S, H, A = 2, 8, 32, 32

    key = jax.random.PRNGKey(0)
    kx, kw, kb, ku = jax.random.split(key, 4)

    x = jax.random.normal(kx, (B, S, H), dtype=jnp.float32)
    # nn.init.normal_(std=0.1) equivalents (deterministic, in-script).
    W_omega = 0.1 * jax.random.normal(kw, (H, A), dtype=jnp.float32)
    b_omega = 0.1 * jax.random.normal(kb, (A,), dtype=jnp.float32)
    u_omega = 0.1 * jax.random.normal(ku, (A,), dtype=jnp.float32)

    ref_out, ref_alphas = _reference(x, W_omega, b_omega, u_omega)

    # f32 path, with alphas.
    out, alphas = attention_layer(x, W_omega, b_omega, u_omega, r_alphas=True)
    out = jax.block_until_ready(out)
    alphas = jax.block_until_ready(alphas)
    assert out.shape == (B, H) and alphas.shape == (B, S)
    assert jnp.allclose(out, ref_out, atol=1e-5, rtol=1e-5)
    assert jnp.allclose(alphas, ref_alphas, atol=1e-5, rtol=1e-5)

    # f32 path, no alphas output (no dead HBM writeback).
    out_only = jax.block_until_ready(
        attention_layer(x, W_omega, b_omega, u_omega, r_alphas=False))
    assert jnp.allclose(out_only, ref_out, atol=1e-5, rtol=1e-5)

    # bf16-input path (f32 accumulation / f32 softmax) — looser tolerance;
    # `out` inherits bf16 input precision (bandwidth/accuracy trade-off).
    out_bf, alphas_bf = attention_layer(x, W_omega, b_omega, u_omega,
                                        r_alphas=True,
                                        compute_dtype=jnp.bfloat16)
    out_bf = jax.block_until_ready(out_bf)
    alphas_bf = jax.block_until_ready(alphas_bf)
    assert jnp.allclose(out_bf, ref_out, atol=3e-2, rtol=3e-2)
    assert jnp.allclose(alphas_bf, ref_alphas, atol=3e-2, rtol=3e-2)

    print("KERNEL_OK")
</pallas_src>

<mosaic_0001>
module attributes {stable_mosaic.version = 11 : i64} {
  func.func @_attention_kernel(%arg0: i32, %arg1: memref<8x8x32xf32, #tpu.memory_space<vmem>>, %arg2: memref<32x128xf32, #tpu.memory_space<vmem>>, %arg3: memref<1x128xf32, #tpu.memory_space<vmem>>, %arg4: memref<1x128xf32, #tpu.memory_space<vmem>>, %arg5: memref<8x32xf32, #tpu.memory_space<vmem>>, %arg6: memref<8x8xf32, #tpu.memory_space<vmem>>) attributes {dimension_semantics = [#tpu.dimension_semantics<parallel>], iteration_bounds = array<i64: 1>, scalar_prefetch = 0 : i64, scratch_operands = 0 : i64, tpu.core_type = #tpu.core_type<tc>, window_params = [{transform_indices = @transform_0, window_bounds = array<i64: 8, 8, 32>}, {pipeline_mode = #tpu.pipeline_mode<synchronous>, transform_indices = @transform_1, window_bounds = array<i64: 32, 128>}, {pipeline_mode = #tpu.pipeline_mode<synchronous>, transform_indices = @transform_2, window_bounds = array<i64: 1, 128>}, {pipeline_mode = #tpu.pipeline_mode<synchronous>, transform_indices = @transform_3, window_bounds = array<i64: 1, 128>}, {transform_indices = @transform_4, window_bounds = array<i64: 8, 32>}, {transform_indices = @transform_5, window_bounds = array<i64: 8, 8>}]} {
    %c0 = arith.constant 0 : index
    %c0_0 = arith.constant 0 : index
    %0 = vector.load %arg2[%c0, %c0_0] : memref<32x128xf32, #tpu.memory_space<vmem>>, vector<32x128xf32>
    %c0_1 = arith.constant 0 : index
    %c0_2 = arith.constant 0 : index
    %1 = vector.load %arg3[%c0_1, %c0_2] : memref<1x128xf32, #tpu.memory_space<vmem>>, vector<1x128xf32>
    %c0_3 = arith.constant 0 : index
    %c0_4 = arith.constant 0 : index
    %2 = vector.load %arg4[%c0_3, %c0_4] : memref<1x128xf32, #tpu.memory_space<vmem>>, vector<1x128xf32>
    %c0_5 = arith.constant 0 : index
    %c0_6 = arith.constant 0 : index
    %c0_7 = arith.constant 0 : index
    %3 = vector.load %arg1[%c0_5, %c0_6, %c0_7] : memref<8x8x32xf32, #tpu.memory_space<vmem>>, vector<8x1x32xf32>
    %4 = vector.shape_cast %3 : vector<8x1x32xf32> to vector<8x32xf32>
    %cst = arith.constant dense<0.000000e+00> : vector<8x128xf32>
    %5 = tpu.matmul %4, %0, %cst {dimension_numbers = #tpu.dot_dimension_numbers<[1], [0], [0], [1], [0, 0, 1, 1], [], []>} : vector<8x32xf32>, vector<32x128xf32>, vector<8x128xf32> -> vector<8x128xf32>
    %6 = vector.broadcast %1 : vector<1x128xf32> to vector<8x128xf32>
    %7 = arith.addf %5, %6 : vector<8x128xf32>
    %8 = math.tanh %7 : vector<8x128xf32>
    %9 = vector.broadcast %2 : vector<1x128xf32> to vector<8x128xf32>
    %10 = arith.mulf %8, %9 : vector<8x128xf32>
    %cst_8 = arith.constant dense<0.000000e+00> : vector<8xf32>
    %11 = vector.multi_reduction <add>, %10, %cst_8 [1] : vector<8x128xf32> to vector<8xf32>
    %12 = vector.shape_cast %11 : vector<8xf32> to vector<8x1xf32>
    %c0_9 = arith.constant 0 : index
    %c1 = arith.constant 1 : index
    %c0_10 = arith.constant 0 : index
    %13 = vector.load %arg1[%c0_9, %c1, %c0_10] : memref<8x8x32xf32, #tpu.memory_space<vmem>>, vector<8x1x32xf32>
    %14 = vector.shape_cast %13 : vector<8x1x32xf32> to vector<8x32xf32>
    %cst_11 = arith.constant dense<0.000000e+00> : vector<8x128xf32>
    %15 = tpu.matmul %14, %0, %cst_11 {dimension_numbers = #tpu.dot_dimension_numbers<[1], [0], [0], [1], [0, 0, 1, 1], [], []>} : vector<8x32xf32>, vector<32x128xf32>, vector<8x128xf32> -> vector<8x128xf32>
    %16 = vector.broadcast %1 : vector<1x128xf32> to vector<8x128xf32>
    %17 = arith.addf %15, %16 : vector<8x128xf32>
    %18 = math.tanh %17 : vector<8x128xf32>
    %19 = vector.broadcast %2 : vector<1x128xf32> to vector<8x128xf32>
    %20 = arith.mulf %18, %19 : vector<8x128xf32>
    %cst_12 = arith.constant dense<0.000000e+00> : vector<8xf32>
    %21 = vector.multi_reduction <add>, %20, %cst_12 [1] : vector<8x128xf32> to vector<8xf32>
    %22 = vector.shape_cast %21 : vector<8xf32> to vector<8x1xf32>
    %c0_13 = arith.constant 0 : index
    %c2 = arith.constant 2 : index
    %c0_14 = arith.constant 0 : index
    %23 = vector.load %arg1[%c0_13, %c2, %c0_14] : memref<8x8x32xf32, #tpu.memory_space<vmem>>, vector<8x1x32xf32>
    %24 = vector.shape_cast %23 : vector<8x1x32xf32> to vector<8x32xf32>
    %cst_15 = arith.constant dense<0.000000e+00> : vector<8x128xf32>
    %25 = tpu.matmul %24, %0, %cst_15 {dimension_numbers = #tpu.dot_dimension_numbers<[1], [0], [0], [1], [0, 0, 1, 1], [], []>} : vector<8x32xf32>, vector<32x128xf32>, vector<8x128xf32> -> vector<8x128xf32>
    %26 = vector.broadcast %1 : vector<1x128xf32> to vector<8x128xf32>
    %27 = arith.addf %25, %26 : vector<8x128xf32>
    %28 = math.tanh %27 : vector<8x128xf32>
    %29 = vector.broadcast %2 : vector<1x128xf32> to vector<8x128xf32>
    %30 = arith.mulf %28, %29 : vector<8x128xf32>
    %cst_16 = arith.constant dense<0.000000e+00> : vector<8xf32>
    %31 = vector.multi_reduction <add>, %30, %cst_16 [1] : vector<8x128xf32> to vector<8xf32>
    %32 = vector.shape_cast %31 : vector<8xf32> to vector<8x1xf32>
    %c0_17 = arith.constant 0 : index
    %c3 = arith.constant 3 : index
    %c0_18 = arith.constant 0 : index
    %33 = vector.load %arg1[%c0_17, %c3, %c0_18] : memref<8x8x32xf32, #tpu.memory_space<vmem>>, vector<8x1x32xf32>
    %34 = vector.shape_cast %33 : vector<8x1x32xf32> to vector<8x32xf32>
    %cst_19 = arith.constant dense<0.000000e+00> : vector<8x128xf32>
    %35 = tpu.matmul %34, %0, %cst_19 {dimension_numbers = #tpu.dot_dimension_numbers<[1], [0], [0], [1], [0, 0, 1, 1], [], []>} : vector<8x32xf32>, vector<32x128xf32>, vector<8x128xf32> -> vector<8x128xf32>
    %36 = vector.broadcast %1 : vector<1x128xf32> to vector<8x128xf32>
    %37 = arith.addf %35, %36 : vector<8x128xf32>
    %38 = math.tanh %37 : vector<8x128xf32>
    %39 = vector.broadcast %2 : vector<1x128xf32> to vector<8x128xf32>
    %40 = arith.mulf %38, %39 : vector<8x128xf32>
    %cst_20 = arith.constant dense<0.000000e+00> : vector<8xf32>
    %41 = vector.multi_reduction <add>, %40, %cst_20 [1] : vector<8x128xf32> to vector<8xf32>
    %42 = vector.shape_cast %41 : vector<8xf32> to vector<8x1xf32>
    %c0_21 = arith.constant 0 : index
    %c4 = arith.constant 4 : index
    %c0_22 = arith.constant 0 : index
    %43 = vector.load %arg1[%c0_21, %c4, %c0_22] : memref<8x8x32xf32, #tpu.memory_space<vmem>>, vector<8x1x32xf32>
    %44 = vector.shape_cast %43 : vector<8x1x32xf32> to vector<8x32xf32>
    %cst_23 = arith.constant dense<0.000000e+00> : vector<8x128xf32>
    %45 = tpu.matmul %44, %0, %cst_23 {dimension_numbers = #tpu.dot_dimension_numbers<[1], [0], [0], [1], [0, 0, 1, 1], [], []>} : vector<8x32xf32>, vector<32x128xf32>, vector<8x128xf32> -> vector<8x128xf32>
    %46 = vector.broadcast %1 : vector<1x128xf32> to vector<8x128xf32>
    %47 = arith.addf %45, %46 : vector<8x128xf32>
    %48 = math.tanh %47 : vector<8x128xf32>
    %49 = vector.broadcast %2 : vector<1x128xf32> to vector<8x128xf32>
    %50 = arith.mulf %48, %49 : vector<8x128xf32>
    %cst_24 = arith.constant dense<0.000000e+00> : vector<8xf32>
    %51 = vector.multi_reduction <add>, %50, %cst_24 [1] : vector<8x128xf32> to vector<8xf32>
    %52 = vector.shape_cast %51 : vector<8xf32> to vector<8x1xf32>
    %c0_25 = arith.constant 0 : index
    %c5 = arith.constant 5 : index
    %c0_26 = arith.constant 0 : index
    %53 = vector.load %arg1[%c0_25, %c5, %c0_26] : memref<8x8x32xf32, #tpu.memory_space<vmem>>, vector<8x1x32xf32>
    %54 = vector.shape_cast %53 : vector<8x1x32xf32> to vector<8x32xf32>
    %cst_27 = arith.constant dense<0.000000e+00> : vector<8x128xf32>
    %55 = tpu.matmul %54, %0, %cst_27 {dimension_numbers = #tpu.dot_dimension_numbers<[1], [0], [0], [1], [0, 0, 1, 1], [], []>} : vector<8x32xf32>, vector<32x128xf32>, vector<8x128xf32> -> vector<8x128xf32>
    %56 = vector.broadcast %1 : vector<1x128xf32> to vector<8x128xf32>
    %57 = arith.addf %55, %56 : vector<8x128xf32>
    %58 = math.tanh %57 : vector<8x128xf32>
    %59 = vector.broadcast %2 : vector<1x128xf32> to vector<8x128xf32>
    %60 = arith.mulf %58, %59 : vector<8x128xf32>
    %cst_28 = arith.constant dense<0.000000e+00> : vector<8xf32>
    %61 = vector.multi_reduction <add>, %60, %cst_28 [1] : vector<8x128xf32> to vector<8xf32>
    %62 = vector.shape_cast %61 : vector<8xf32> to vector<8x1xf32>
    %c0_29 = arith.constant 0 : index
    %c6 = arith.constant 6 : index
    %c0_30 = arith.constant 0 : index
    %63 = vector.load %arg1[%c0_29, %c6, %c0_30] : memref<8x8x32xf32, #tpu.memory_space<vmem>>, vector<8x1x32xf32>
    %64 = vector.shape_cast %63 : vector<8x1x32xf32> to vector<8x32xf32>
    %cst_31 = arith.constant dense<0.000000e+00> : vector<8x128xf32>
    %65 = tpu.matmul %64, %0, %cst_31 {dimension_numbers = #tpu.dot_dimension_numbers<[1], [0], [0], [1], [0, 0, 1, 1], [], []>} : vector<8x32xf32>, vector<32x128xf32>, vector<8x128xf32> -> vector<8x128xf32>
    %66 = vector.broadcast %1 : vector<1x128xf32> to vector<8x128xf32>
    %67 = arith.addf %65, %66 : vector<8x128xf32>
    %68 = math.tanh %67 : vector<8x128xf32>
    %69 = vector.broadcast %2 : vector<1x128xf32> to vector<8x128xf32>
    %70 = arith.mulf %68, %69 : vector<8x128xf32>
    %cst_32 = arith.constant dense<0.000000e+00> : vector<8xf32>
    %71 = vector.multi_reduction <add>, %70, %cst_32 [1] : vector<8x128xf32> to vector<8xf32>
    %72 = vector.shape_cast %71 : vector<8xf32> to vector<8x1xf32>
    %c0_33 = arith.constant 0 : index
    %c7 = arith.constant 7 : index
    %c0_34 = arith.constant 0 : index
    %73 = vector.load %arg1[%c0_33, %c7, %c0_34] : memref<8x8x32xf32, #tpu.memory_space<vmem>>, vector<8x1x32xf32>
    %74 = vector.shape_cast %73 : vector<8x1x32xf32> to vector<8x32xf32>
    %cst_35 = arith.constant dense<0.000000e+00> : vector<8x128xf32>
    %75 = tpu.matmul %74, %0, %cst_35 {dimension_numbers = #tpu.dot_dimension_numbers<[1], [0], [0], [1], [0, 0, 1, 1], [], []>} : vector<8x32xf32>, vector<32x128xf32>, vector<8x128xf32> -> vector<8x128xf32>
    %76 = vector.broadcast %1 : vector<1x128xf32> to vector<8x128xf32>
    %77 = arith.addf %75, %76 : vector<8x128xf32>
    %78 = math.tanh %77 : vector<8x128xf32>
    %79 = vector.broadcast %2 : vector<1x128xf32> to vector<8x128xf32>
    %80 = arith.mulf %78, %79 : vector<8x128xf32>
    %cst_36 = arith.constant dense<0.000000e+00> : vector<8xf32>
    %81 = vector.multi_reduction <add>, %80, %cst_36 [1] : vector<8x128xf32> to vector<8xf32>
    %82 = vector.shape_cast %81 : vector<8xf32> to vector<8x1xf32>
    %83 = tpu.concatenate %12, %22, %32, %42, %52, %62, %72, %82 in 1 : vector<8x1xf32>, vector<8x1xf32>, vector<8x1xf32>, vector<8x1xf32>, vector<8x1xf32>, vector<8x1xf32>, vector<8x1xf32>, vector<8x1xf32> -> vector<8x8xf32>
    %cst_37 = arith.constant dense<0xFF800000> : vector<8xf32>
    %84 = vector.multi_reduction <maximumf>, %83, %cst_37 [1] : vector<8x8xf32> to vector<8xf32>
    %85 = vector.shape_cast %84 : vector<8xf32> to vector<8x1xf32>
    %86 = vector.broadcast %85 : vector<8x1xf32> to vector<8x8xf32>
    %87 = arith.subf %83, %86 : vector<8x8xf32>
    %88 = math.exp %87 : vector<8x8xf32>
    %cst_38 = arith.constant dense<0.000000e+00> : vector<8xf32>
    %89 = vector.multi_reduction <add>, %88, %cst_38 [1] : vector<8x8xf32> to vector<8xf32>
    %90 = vector.shape_cast %89 : vector<8xf32> to vector<8x1xf32>
    %91 = vector.broadcast %90 : vector<8x1xf32> to vector<8x8xf32>
    %92 = arith.divf %88, %91 : vector<8x8xf32>
    %cst_39 = arith.constant 0.000000e+00 : f32
    %93 = vector.broadcast %cst_39 : f32 to vector<8x32xf32>
    %c0_40 = arith.constant 0 : index
    %c0_41 = arith.constant 0 : index
    %c0_42 = arith.constant 0 : index
    %94 = vector.load %arg1[%c0_40, %c0_41, %c0_42] : memref<8x8x32xf32, #tpu.memory_space<vmem>>, vector<8x1x32xf32>
    %95 = vector.shape_cast %94 : vector<8x1x32xf32> to vector<8x32xf32>
    %96 = vector.extract_strided_slice %92 {offsets = [0, 0], sizes = [8, 1], strides = [1, 1]} : vector<8x8xf32> to vector<8x1xf32>
    %97 = vector.broadcast %96 : vector<8x1xf32> to vector<8x32xf32>
    %98 = arith.mulf %95, %97 : vector<8x32xf32>
    %99 = arith.addf %93, %98 : vector<8x32xf32>
    %c0_43 = arith.constant 0 : index
    %c1_44 = arith.constant 1 : index
    %c0_45 = arith.constant 0 : index
    %100 = vector.load %arg1[%c0_43, %c1_44, %c0_45] : memref<8x8x32xf32, #tpu.memory_space<vmem>>, vector<8x1x32xf32>
    %101 = vector.shape_cast %100 : vector<8x1x32xf32> to vector<8x32xf32>
    %102 = vector.extract_strided_slice %92 {offsets = [0, 1], sizes = [8, 1], strides = [1, 1]} : vector<8x8xf32> to vector<8x1xf32>
    %103 = vector.broadcast %102 : vector<8x1xf32> to vector<8x32xf32>
    %104 = arith.mulf %101, %103 : vector<8x32xf32>
    %105 = arith.addf %99, %104 : vector<8x32xf32>
    %c0_46 = arith.constant 0 : index
    %c2_47 = arith.constant 2 : index
    %c0_48 = arith.constant 0 : index
    %106 = vector.load %arg1[%c0_46, %c2_47, %c0_48] : memref<8x8x32xf32, #tpu.memory_space<vmem>>, vector<8x1x32xf32>
    %107 = vector.shape_cast %106 : vector<8x1x32xf32> to vector<8x32xf32>
    %108 = vector.extract_strided_slice %92 {offsets = [0, 2], sizes = [8, 1], strides = [1, 1]} : vector<8x8xf32> to vector<8x1xf32>
    %109 = vector.broadcast %108 : vector<8x1xf32> to vector<8x32xf32>
    %110 = arith.mulf %107, %109 : vector<8x32xf32>
    %111 = arith.addf %105, %110 : vector<8x32xf32>
    %c0_49 = arith.constant 0 : index
    %c3_50 = arith.constant 3 : index
    %c0_51 = arith.constant 0 : index
    %112 = vector.load %arg1[%c0_49, %c3_50, %c0_51] : memref<8x8x32xf32, #tpu.memory_space<vmem>>, vector<8x1x32xf32>
    %113 = vector.shape_cast %112 : vector<8x1x32xf32> to vector<8x32xf32>
    %114 = vector.extract_strided_slice %92 {offsets = [0, 3], sizes = [8, 1], strides = [1, 1]} : vector<8x8xf32> to vector<8x1xf32>
    %115 = vector.broadcast %114 : vector<8x1xf32> to vector<8x32xf32>
    %116 = arith.mulf %113, %115 : vector<8x32xf32>
    %117 = arith.addf %111, %116 : vector<8x32xf32>
    %c0_52 = arith.constant 0 : index
    %c4_53 = arith.constant 4 : index
    %c0_54 = arith.constant 0 : index
    %118 = vector.load %arg1[%c0_52, %c4_53, %c0_54] : memref<8x8x32xf32, #tpu.memory_space<vmem>>, vector<8x1x32xf32>
    %119 = vector.shape_cast %118 : vector<8x1x32xf32> to vector<8x32xf32>
    %120 = vector.extract_strided_slice %92 {offsets = [0, 4], sizes = [8, 1], strides = [1, 1]} : vector<8x8xf32> to vector<8x1xf32>
    %121 = vector.broadcast %120 : vector<8x1xf32> to vector<8x32xf32>
    %122 = arith.mulf %119, %121 : vector<8x32xf32>
    %123 = arith.addf %117, %122 : vector<8x32xf32>
    %c0_55 = arith.constant 0 : index
    %c5_56 = arith.constant 5 : index
    %c0_57 = arith.constant 0 : index
    %124 = vector.load %arg1[%c0_55, %c5_56, %c0_57] : memref<8x8x32xf32, #tpu.memory_space<vmem>>, vector<8x1x32xf32>
    %125 = vector.shape_cast %124 : vector<8x1x32xf32> to vector<8x32xf32>
    %126 = vector.extract_strided_slice %92 {offsets = [0, 5], sizes = [8, 1], strides = [1, 1]} : vector<8x8xf32> to vector<8x1xf32>
    %127 = vector.broadcast %126 : vector<8x1xf32> to vector<8x32xf32>
    %128 = arith.mulf %125, %127 : vector<8x32xf32>
    %129 = arith.addf %123, %128 : vector<8x32xf32>
    %c0_58 = arith.constant 0 : index
    %c6_59 = arith.constant 6 : index
    %c0_60 = arith.constant 0 : index
    %130 = vector.load %arg1[%c0_58, %c6_59, %c0_60] : memref<8x8x32xf32, #tpu.memory_space<vmem>>, vector<8x1x32xf32>
    %131 = vector.shape_cast %130 : vector<8x1x32xf32> to vector<8x32xf32>
    %132 = vector.extract_strided_slice %92 {offsets = [0, 6], sizes = [8, 1], strides = [1, 1]} : vector<8x8xf32> to vector<8x1xf32>
    %133 = vector.broadcast %132 : vector<8x1xf32> to vector<8x32xf32>
    %134 = arith.mulf %131, %133 : vector<8x32xf32>
    %135 = arith.addf %129, %134 : vector<8x32xf32>
    %c0_61 = arith.constant 0 : index
    %c7_62 = arith.constant 7 : index
    %c0_63 = arith.constant 0 : index
    %136 = vector.load %arg1[%c0_61, %c7_62, %c0_63] : memref<8x8x32xf32, #tpu.memory_space<vmem>>, vector<8x1x32xf32>
    %137 = vector.shape_cast %136 : vector<8x1x32xf32> to vector<8x32xf32>
    %138 = vector.extract_strided_slice %92 {offsets = [0, 7], sizes = [8, 1], strides = [1, 1]} : vector<8x8xf32> to vector<8x1xf32>
    %139 = vector.broadcast %138 : vector<8x1xf32> to vector<8x32xf32>
    %140 = arith.mulf %137, %139 : vector<8x32xf32>
    %141 = arith.addf %135, %140 : vector<8x32xf32>
    %c0_64 = arith.constant 0 : index
    %c0_65 = arith.constant 0 : index
    %142 = vector.load %arg5[%c0_64, %c0_65] : memref<8x32xf32, #tpu.memory_space<vmem>>, vector<8x32xf32>
    tpu.vector_store %arg5[%c0_64, %c0_65], %141 {strides = array<i32>} : memref<8x32xf32, #tpu.memory_space<vmem>>, vector<8x32xf32>,
    %c0_66 = arith.constant 0 : index
    %c0_67 = arith.constant 0 : index
    %143 = vector.load %arg6[%c0_66, %c0_67] : memref<8x8xf32, #tpu.memory_space<vmem>>, vector<8x8xf32>
    tpu.vector_store %arg6[%c0_66, %c0_67], %92 {strides = array<i32>} : memref<8x8xf32, #tpu.memory_space<vmem>>, vector<8x8xf32>,
    return
  }
  func.func @transform_0(%arg0: i32) -> (i32, i32, i32) {
    %c0_i32 = arith.constant 0 : i32
    %c0_i32_0 = arith.constant 0 : i32
    %c0_i32_1 = arith.constant 0 : i32
    return %arg0, %c0_i32, %c0_i32_0 : i32, i32, i32
  }
  func.func @transform_1(%arg0: i32) -> (i32, i32) {
    %c0_i32 = arith.constant 0 : i32
    %c0_i32_0 = arith.constant 0 : i32
    %c0_i32_1 = arith.constant 0 : i32
    return %c0_i32, %c0_i32_0 : i32, i32
  }
  func.func @transform_2(%arg0: i32) -> (i32, i32) {
    %c0_i32 = arith.constant 0 : i32
    %c0_i32_0 = arith.constant 0 : i32
    %c0_i32_1 = arith.constant 0 : i32
    return %c0_i32, %c0_i32_0 : i32, i32
  }
  func.func @transform_3(%arg0: i32) -> (i32, i32) {
    %c0_i32 = arith.constant 0 : i32
    %c0_i32_0 = arith.constant 0 : i32
    %c0_i32_1 = arith.constant 0 : i32
    return %c0_i32, %c0_i32_0 : i32, i32
  }
  func.func @transform_4(%arg0: i32) -> (i32, i32) {
    %c0_i32 = arith.constant 0 : i32
    %c0_i32_0 = arith.constant 0 : i32
    return %arg0, %c0_i32 : i32, i32
  }
  func.func @transform_5(%arg0: i32) -> (i32, i32) {
    %c0_i32 = arith.constant 0 : i32
    %c0_i32_0 = arith.constant 0 : i32
    return %arg0, %c0_i32 : i32, i32
  }
}

</mosaic_0001>

<bundles_post_ra>
// kernel: tpu_custom_call.1
= control target key start
LH: loop header
LB: loop body
LE: loop exit
PB: predicated region body
PF: predicated region fallthrough
CT: control target
= control target key end

     0   :  { %11 = vsyncpa [#allocation3], 0  ;;  %s2096_s0 = inlined_call_operand.hbm [shape: f32[8,8,32], index: 0, kind: input, shape index: {}]   ;;  %s2097_s1 = inlined_call_operand.hbm [shape: f32[32,128], index: 1, kind: input, shape index: {}]   ;;  %s2098_s2 = inlined_call_operand.vmem [shape: f32[1,128], index: 2, kind: input, shape index: {}]   ;;  %s2099_s3 = inlined_call_operand.vmem [shape: f32[1,128], index: 3, kind: input, shape index: {}]   ;;  %s2100_s4 = inlined_call_operand.hbm [shape: f32[8,32], index: 4, kind: output, shape index: {0}]   ;;  %s2101_s5 = inlined_call_operand.hbm [shape: f32[8,8], index: 5, kind: output, shape index: {1}]  }
   0x1   :  { %12 = vsyncpa [#allocation6], 0 }
   0x2   :  { %13 = vsyncpa [#allocation4], 0 }
   0x3   :  { %14 = vsyncpa [#allocation9], 0  ;;  %s1548_s18 = smov [#allocation2]  }
   0x4   :  { %s20_s19 = sshll.u32 %s1548_s18, 4  ;;  %s21_s19 = int_to_ptr.vmem [resolvable:$true] %s20_s19 }
   0x5   :  { %s1468_s20 = scalar_lea.vmem %s21_s19, 1024  ;;  %p1473_p1 = scmp.lt.s32.totalorder %s21_s19, %s21_s19 }
   0x6   :  { %p1469_p0 = scmp.ne.s32.totalorder %s21_s19, %s1468_s20  ;;  %p1474_p2 = scmp.lt.s32.totalorder %s1468_s20, %s1468_s20 }
   0x8   :  { %p1475_p3 = por %p1474_p2, %p1473_p1 }
   0xa   :  { %p1476_p4 = pnand %p1475_p3, %p1469_p0 }
   0xc   :  { %1479 = shalt.err (!%p1476_p4)
}
   0xd   :  { %s1549_s21 = smov 128   ;;  %s1550_s22 = smov 8  }
   0xe   :  { %26 = dma.hbm_to_vmem [thread:$0]  %s2096_s0, 1024, %s21_s19, [#allocation3], %s1549_s21, %s1549_s21, %s1550_s22  }
   0xf   :  { %s1551_s25 = smov [#allocation5]  }
  0x10   :  { %s32_s26 = sshll.u32 %s1551_s25, 4  ;;  %s33_s26 = int_to_ptr.vmem [resolvable:$true] %s32_s26 }
  0x11   :  { %s1488_s27 = scalar_lea.vmem %s33_s26, 512  ;;  %p1493_p6 = scmp.lt.s32.totalorder %s33_s26, %s33_s26 }
  0x12   :  { %p1489_p5 = scmp.ne.s32.totalorder %s33_s26, %s1488_s27  ;;  %p1494_p7 = scmp.lt.s32.totalorder %s1488_s27, %s1488_s27 }
  0x14   :  { %p1495_p8 = por %p1494_p7, %p1493_p6 }
  0x16   :  { %p1496_p9 = pnand %p1495_p8, %p1489_p5 }
  0x18   :  { %1499 = shalt.err (!%p1496_p9)
}
  0x19   :  { %38 = dma.hbm_to_vmem [thread:$0]  %s2097_s1, 512, %s33_s26, [#allocation6], %s1549_s21, %s1549_s21, %s1550_s22  }
  0x1a   :  { %1540 = dma.done.wait [#allocation3], 1024  }
  0x1b   :  { %1541 = vsyncadd [#allocation3], 4294966272 }
  0x1c   :  { %1542 = dma.done.wait [#allocation6], 512  }
  0x1d   :  { %1543 = vsyncadd [#allocation6], 4294966784  ;;  %v1552_v0 = vmov 0.0   ;;  %vm1553_vm0 = vmmov 0   ;;  %vm78_vm1 = vcmask 1041409   ;;  %vm81_vm2 = vcmask 1042434  }
  0x1e   :  { %1327 = vmatprep.subr.mxu0 %v1552_v0  ;;  %1338 = vmatprep.subr.mxu1 %v1552_v0  ;;  %v1606_v1 = vld [vmem:[#allocation5 + $0x18] sm:$0xff]  ;;  %v1608_v2 = vld [vmem:[#allocation5 + $0x10] sm:$0xff]  ;;  %vm84_vm3 = vcmask 1043459   ;;  %vm87_vm4 = vcmask 1044484   ;;  %vm90_vm5 = vcmask 1045509   ;;  %vm93_vm6 = vcmask 1046534  }
  0x1f   :  { %1335 = vmatprep.mubr.msk.f32.mxu0 %vm1553_vm0, %v1552_v0  ;;  %1346 = vmatprep.mubr.msk.f32.mxu1 %vm1553_vm0, %v1552_v0  ;;  %v1612_v3 = vld [vmem:[#allocation5 + $0x8] sm:$0xff]  ;;  %v1614_v4 = vld [vmem:[#allocation2] sm:$0x1]  ;;  %vm96_vm7 = vcmask 1047559   ;;  %v1620_v6 = vld [vmem:[#allocation2 + $0x10] sm:$0x1] }
  0x20   :  { %1328 = vmatpush3.msra.mxu0 %v1606_v1  ;;  %1339 = vmatpush3.msra.mxu1 %v1606_v1  ;;  %v1616_v5 = vld [vmem:[#allocation2 + $0x8] sm:$0x1]  ;;  %v1622_v7 = vld [vmem:[#allocation2 + $0x18] sm:$0x1]  ;;  %v1624_v8 = vld [vmem:[#allocation2 + $0x20] sm:$0x1] }
  0x21   :  { %1329 = vmatprep.subr.mxu0 %v1552_v0  ;;  %1340 = vmatprep.subr.mxu1 %v1552_v0  ;;  %v1628_v9 = vld [vmem:[#allocation2 + $0x28] sm:$0x1]  ;;  %v1630_v10 = vld [vmem:[#allocation2 + $0x30] sm:$0x1]  ;;  %v1632_v11 = vld [vmem:[#allocation2 + $0x38] sm:$0x1] }
  0x22   :  { %1330 = vmatpush3.msra.mxu0 %v1608_v2  ;;  %1341 = vmatpush3.msra.mxu1 %v1608_v2  ;;  %v1636_v12 = vld [vmem:[#allocation5] sm:$0xff]  ;;  %v77_v13 = vrot.slane %v1616_v5, 7  ;;  %v80_v14 = vrot.slane %v1620_v6, 6  ;;  %v83_v15 = vrot.slane %v1622_v7, 5  ;;  %vm98_vm8 = vcmask 261120  }
  0x23   :  { %1331 = vmatprep.subr.mxu0 %v1552_v0  ;;  %1342 = vmatprep.subr.mxu1 %v1552_v0  ;;  %v86_v16 = vrot.slane %v1624_v8, 4  ;;  %v89_v17 = vrot.slane %v1628_v9, 3  ;;  %v92_v18 = vrot.slane %v1630_v10, 2  ;;  %v95_v19 = vrot.slane %v1632_v11, 1  ;;  %v1647_v20 = vld [vmem:[#allocation2 + $0x1] sm:$0x1] }
  0x24   :  { %1332 = vmatpush3.msra.mxu0 %v1612_v3  ;;  %1343 = vmatpush3.msra.mxu1 %v1612_v3  ;;  %v1649_v21 = vld [vmem:[#allocation2 + $0x9] sm:$0x1]  ;;  %v79_v22 = vsel %vm78_vm1, %v77_v13, %v1614_v4  ;;  %v1655_v23 = vld [vmem:[#allocation2 + $0x11] sm:$0x1]  ;;  %v1657_v24 = vld [vmem:[#allocation2 + $0x19] sm:$0x1] }
  0x25   :  { %1333 = vmatprep.subr.mxu0 %v1552_v0  ;;  %1344 = vmatprep.subr.mxu1 %v1552_v0  ;;  %v1659_v25 = vld [vmem:[#allocation2 + $0x21] sm:$0x1]  ;;  %v82_v26 = vsel %vm81_vm2, %v80_v14, %v79_v22  ;;  %v1664_v27 = vld [vmem:[#allocation2 + $0x29] sm:$0x1]  ;;  %v1666_v28 = vld [vmem:[#allocation2 + $0x31] sm:$0x1] }
  0x26   :  { %1334 = vmatpush3.msra.mxu0 %v1636_v12  ;;  %1345 = vmatpush3.msra.mxu1 %v1636_v12  ;;  %v1668_v29 = vld [vmem:[#allocation2 + $0x39] sm:$0x1]  ;;  %v85_v30 = vsel %vm84_vm3, %v83_v15, %v82_v26  ;;  %v197_v31 = vrot.slane %v1649_v21, 7  ;;  %v199_v32 = vrot.slane %v1655_v23, 6  ;;  %v201_v33 = vrot.slane %v1657_v24, 5 }
  0x27   :  { %1349 = vmatprep.subr.mxu0 %v1552_v0  ;;  %1360 = vmatprep.subr.mxu1 %v1552_v0  ;;  %v1676_v34 = vld [vmem:[#allocation2 + $0x2] sm:$0x1]  ;;  %v88_v35 = vsel %vm87_vm4, %v86_v16, %v85_v30  ;;  %v203_v36 = vrot.slane %v1659_v25, 4  ;;  %v205_v37 = vrot.slane %v1664_v27, 3  ;;  %v207_v38 = vrot.slane %v1666_v28, 2 }
  0x28   :  { %v1682_v39 = vld [vmem:[#allocation2 + $0xa] sm:$0x1]  ;;  %v91_v40 = vsel %vm90_vm5, %v89_v17, %v88_v35  ;;  %v198_v41 = vsel %vm78_vm1, %v197_v31, %v1647_v20  ;;  %v209_v42 = vrot.slane %v1668_v29, 1  ;;  %v1688_v43 = vld [vmem:[#allocation2 + $0x12] sm:$0x1]  ;;  %vm923_vm9 = vcmask 7168  }
  0x29   :  { %v1690_v44 = vld [vmem:[#allocation2 + $0x1a] sm:$0x1]  ;;  %v303_v45 = vrot.slane %v1682_v39, 7  ;;  %v94_v46 = vsel %vm93_vm6, %v92_v18, %v91_v40  ;;  %v200_v47 = vsel %vm81_vm2, %v199_v32, %v198_v41  ;;  %v1695_v48 = vld [vmem:[#allocation2 + $0x22] sm:$0x1]  ;;  %v305_v55 = vrot.slane %v1688_v43, 6 }
  0x2a   :  { %v1697_v49 = vld [vmem:[#allocation2 + $0x2a] sm:$0x1]  ;;  %v1699_v50 = vld [vmem:[#allocation2 + $0x32] sm:$0x1]  ;;  %v97_v51 = vsel %vm96_vm7, %v95_v19, %v94_v46  ;;  %v202_v52 = vsel %vm84_vm3, %v201_v33, %v200_v47  ;;  %v1703_v53 = vld [vmem:[#allocation2 + $0x3a] sm:$0x1] }
  0x2b   :  { %2124 = vst [vmem:[#allocation14_spill] sm:$0xff] %v1703_v53  ;;  %v304_v54 = vsel %vm78_vm1, %v303_v45, %v1676_v34  ;;  %1336 = vmatmul.mubr.msk.f32.vlgmr.msra.gmra.mxu0 %vm98_vm8, %v97_v51  ;;  %v204_v56 = vsel %vm87_vm4, %v203_v36, %v202_v52  ;;  %v307_v57 = vrot.slane %v1690_v44, 5  ;;  %v309_v58 = vrot.slane %v1695_v48, 4  ;;  %v1713_v60 = vld [vmem:[#allocation2 + $0x3] sm:$0x1] }
  0x2c   :  { %v311_v59 = vrot.slane %v1697_v49, 3  ;;  %v1715_v61 = vld [vmem:[#allocation2 + $0xb] sm:$0x1]  ;;  %v206_v62 = vsel %vm90_vm5, %v205_v37, %v204_v56  ;;  %1350 = vmatpush3.msra.mxu0 %v1606_v1  ;;  %1357 = vmatprep.mubr.msk.f32.mxu0 %vm1553_vm0, %v1552_v0  ;;  %v306_v63 = vsel %vm81_vm2, %v305_v55, %v304_v54  ;;  %v313_v13 = vrot.slane %v1699_v50, 2  ;;  %v1724_v15 = vld [vmem:[#allocation2 + $0x13] sm:$0x1] }
  0x2d   :  { %v315_v14 = vrot.slane %v1703_v53, 1  ;;  %v1726_v16 = vld [vmem:[#allocation2 + $0x1b] sm:$0x1]  ;;  %v208_v17 = vsel %vm93_vm6, %v207_v38, %v206_v62  ;;  %1351 = vmatprep.subr.mxu0 %v1552_v0  ;;  %v308_v18 = vsel %vm84_vm3, %v307_v57, %v306_v63  ;;  %v1731_v19 = vld [vmem:[#allocation2 + $0x23] sm:$0x1]  ;;  %v409_v33 = vrot.slane %v1715_v61, 7 }
  0x2e   :  { %v1733_v22 = vld [vmem:[#allocation2 + $0x2b] sm:$0x1]  ;;  %v1735_v26 = vld [vmem:[#allocation2 + $0x33] sm:$0x1]  ;;  %v210_v30 = vsel %vm96_vm7, %v209_v42, %v208_v17  ;;  %1352 = vmatpush3.msra.mxu0 %v1608_v2  ;;  %v310_v31 = vsel %vm87_vm4, %v309_v58, %v308_v18  ;;  %v1740_v32 = vld [vmem:[#allocation2 + $0x3b] sm:$0x1] }
  0x2f   :  { %2125 = vst [vmem:[#allocation15_spill] sm:$0xff] %v1735_v26  ;;  %2126 = vst [vmem:[#allocation16_spill] sm:$0xff] %v1740_v32  ;;  %v411_v35 = vrot.slane %v1724_v15, 6  ;;  %1347 = vmatmul.mubr.msk.f32.vlgmr.msra.gmra.mxu1 %vm98_vm8, %v210_v30  ;;  %1353 = vmatprep.subr.mxu0 %v1552_v0  ;;  %v312_v36 = vsel %vm90_vm5, %v311_v59, %v310_v31  ;;  %v413_v37 = vrot.slane %v1726_v16, 5  ;;  %v415_v38 = vrot.slane %v1731_v19, 4 }
  0x30   :  { %v417_v40 = vrot.slane %v1733_v22, 3  ;;  %v1750_v41 = vld [vmem:[#allocation2 + $0x4] sm:$0x1]  ;;  %v1752_v42 = vld [vmem:[#allocation2 + $0xc] sm:$0x1]  ;;  %1361 = vmatpush3.msra.mxu1 %v1606_v1  ;;  %1354 = vmatpush3.msra.mxu0 %v1612_v3  ;;  %v314_v45 = vsel %vm93_vm6, %v313_v13, %v312_v36  ;;  %v410_v46 = vsel %vm78_vm1, %v409_v33, %v1713_v60  ;;  %v419_v47 = vrot.slane %v1735_v26, 2 }
  0x31   :  { %v421_v51 = vrot.slane %v1740_v32, 1  ;;  %v1761_v52 = vld [vmem:[#allocation2 + $0x14] sm:$0x1]  ;;  %v1763_v54 = vld [vmem:[#allocation2 + $0x1c] sm:$0x1]  ;;  %1362 = vmatprep.subr.mxu1 %v1552_v0  ;;  %1355 = vmatprep.subr.mxu0 %v1552_v0  ;;  %v316_v55 = vsel %vm96_vm7, %v315_v14, %v314_v45  ;;  %v412_v56 = vsel %vm81_vm2, %v411_v35, %v410_v46  ;;  %v515_v13 = vrot.slane %v1752_v42, 7 }
  0x32   :  { %v1769_v57 = vld [vmem:[#allocation2 + $0x24] sm:$0x1]  ;;  %v1771_v58 = vld [vmem:[#allocation2 + $0x2c] sm:$0x1]  ;;  %v1773_v59 = vld [vmem:[#allocation2 + $0x34] sm:$0x1]  ;;  %1363 = vmatpush3.msra.mxu1 %v1608_v2  ;;  %1356 = vmatpush3.msra.mxu0 %v1636_v12  ;;  %v414_v62 = vsel %vm84_vm3, %v413_v37, %v412_v56 }
  0x33   :  { %2127 = vst [vmem:[#allocation17_spill] sm:$0xff] %v1771_v58  ;;  %2128 = vst [vmem:[#allocation18_spill] sm:$0xff] %v1773_v59  ;;  %v1778_v63 = vld [vmem:[#allocation2 + $0x3c] sm:$0x1]  ;;  %v517_v14 = vrot.slane %v1761_v52, 6  ;;  %v519_v17 = vrot.slane %v1763_v54, 5  ;;  %1364 = vmatprep.subr.mxu1 %v1552_v0  ;;  %1368 = vmatprep.mubr.msk.f32.mxu1 %vm1553_vm0, %v1552_v0  ;;  %v416_v18 = vsel %vm87_vm4, %v415_v38, %v414_v62 }
  0x34   :  { %2129 = vst [vmem:[#allocation19_spill] sm:$0xff] %v1778_v63  ;;  %v521_v30 = vrot.slane %v1769_v57, 4  ;;  %v523_v31 = vrot.slane %v1771_v58, 3  ;;  %v1789_v33 = vld [vmem:[#allocation2 + $0x5] sm:$0x1]  ;;  %1365 = vmatpush3.msra.mxu1 %v1612_v3  ;;  %1358 = vmatmul.mubr.msk.f32.vlgmr.msra.gmra.mxu0 %vm98_vm8, %v316_v55  ;;  %v418_v35 = vsel %vm90_vm5, %v417_v40, %v416_v18  ;;  %v516_v36 = vsel %vm78_vm1, %v515_v13, %v1750_v41 }
  0x35   :  { %v525_v37 = vrot.slane %v1773_v59, 2  ;;  %v527_v45 = vrot.slane %v1778_v63, 1  ;;  %v1798_v38 = vld [vmem:[#allocation2 + $0xd] sm:$0x1]  ;;  %v1800_v46 = vld [vmem:[#allocation2 + $0x15] sm:$0x1]  ;;  %1366 = vmatprep.subr.mxu1 %v1552_v0  ;;  %v420_v56 = vsel %vm93_vm6, %v419_v47, %v418_v35  ;;  %1371 = vmatprep.subr.mxu0 %v1552_v0  ;;  %v518_v55 = vsel %vm81_vm2, %v517_v14, %v516_v36 }
  0x36   :  { %v1806_v40 = vld [vmem:[#allocation2 + $0x1d] sm:$0x1]  ;;  %v1808_v62 = vld [vmem:[#allocation2 + $0x25] sm:$0x1]  ;;  %v1810_v13 = vld [vmem:[#allocation2 + $0x2d] sm:$0x1]  ;;  %1367 = vmatpush3.msra.mxu1 %v1636_v12  ;;  %v422_v18 = vsel %vm96_vm7, %v421_v51, %v420_v56  ;;  %1372 = vmatpush3.msra.mxu0 %v1606_v1  ;;  %v520_v63 = vsel %vm84_vm3, %v519_v17, %v518_v55 }
  0x37   :  { %2130 = vst [vmem:[#allocation20_spill] sm:$0xff] %v1806_v40  ;;  %2131 = vst [vmem:[#allocation21_spill] sm:$0xff] %v1808_v62  ;;  %v1816_v59 = vld [vmem:[#allocation2 + $0x35] sm:$0x1]  ;;  %v621_v47 = vrot.slane %v1798_v38, 7  ;;  %v623_v14 = vrot.slane %v1800_v46, 6  ;;  %1369 = vmatmul.mubr.msk.f32.vlgmr.msra.gmra.mxu1 %vm98_vm8, %v422_v18  ;;  %1382 = vmatprep.subr.mxu1 %v1552_v0  ;;  %v522_v35 = vsel %vm87_vm4, %v521_v30, %v520_v63 }
  0x38   :  { %2132 = vst [vmem:[#allocation22_spill] sm:$0xff] %v1810_v13  ;;  %2133 = vst [vmem:[#allocation23_spill] sm:$0xff] %v1816_v59  ;;  %v1823_v36 = vld [vmem:[#allocation2 + $0x3d] sm:$0x1]  ;;  %v625_v51 = vrot.slane %v1806_v40, 5  ;;  %v627_v56 = vrot.slane %v1808_v62, 4  ;;  %1383 = vmatpush3.msra.mxu1 %v1606_v1  ;;  %1373 = vmatprep.subr.mxu0 %v1552_v0  ;;  %v524_v17 = vsel %vm90_vm5, %v523_v31, %v522_v35 }
  0x39   :  { %2134 = vst [vmem:[#allocation24_spill] sm:$0xff] %v1823_v36  ;;  %v1827_v58 = vld [vmem:[#allocation2 + $0x6] sm:$0x1]  ;;  %v622_v55 = vsel %vm78_vm1, %v621_v47, %v1789_v33  ;;  %v629_v18 = vrot.slane %v1810_v13, 3  ;;  %v631_v63 = vrot.slane %v1816_v59, 2  ;;  %1384 = vmatprep.subr.mxu1 %v1552_v0  ;;  %1374 = vmatpush3.msra.mxu0 %v1608_v2  ;;  %v526_v62 = vsel %vm93_vm6, %v525_v37, %v524_v17 }
  0x3a   :  { %2135 = vst [vmem:[#allocation25_spill] sm:$0xff] %v1827_v58  ;;  %v1836_v30 = vld [vmem:[#allocation2 + $0xe] sm:$0x1]  ;;  %v1838_v32 = vld [vmem:[#allocation2 + $0x16] sm:$0x1]  ;;  %v624_v26 = vsel %vm81_vm2, %v623_v14, %v622_v55  ;;  %1385 = vmatpush3.msra.mxu1 %v1608_v2  ;;  %1375 = vmatprep.subr.mxu0 %v1552_v0  ;;  %v633_v13 = vrot.slane %v1823_v36, 1 }
  0x3b   :  { %2136 = vst [vmem:[#allocation26_spill] sm:$0xff] %v1836_v30  ;;  %2137 = vst [vmem:[#allocation27_spill] sm:$0xff] %v1838_v32  ;;  %v1844_v31 = vld [vmem:[#allocation2 + $0x1e] sm:$0x1]  ;;  %v1846_v35 = vld [vmem:[#allocation2 + $0x26] sm:$0x1]  ;;  %v626_v59 = vsel %vm84_vm3, %v625_v51, %v624_v26  ;;  %1386 = vmatprep.subr.mxu1 %v1552_v0  ;;  %1376 = vmatpush3.msra.mxu0 %v1612_v3  ;;  %v528_v51 = vsel %vm96_vm7, %v527_v45, %v526_v62 }
  0x3c   :  { %2138 = vst [vmem:[#allocation28_spill] sm:$0xff] %v1844_v31  ;;  %2139 = vst [vmem:[#allocation29_spill] sm:$0xff] %v1846_v35  ;;  %v1848_v47 = vld [vmem:[#allocation2 + $0x2e] sm:$0x1]  ;;  %v727_v53 = vrot.slane %v1836_v30, 7  ;;  %v729_v37 = vrot.slane %v1838_v32, 6  ;;  %v628_v14 = vsel %vm87_vm4, %v627_v56, %v626_v59  ;;  %1387 = vmatpush3.msra.mxu1 %v1612_v3  ;;  %1377 = vmatprep.subr.mxu0 %v1552_v0 }
  0x3d   :  { %2140 = vst [vmem:[#allocation30_spill] sm:$0xff] %v1848_v47  ;;  %v1859_v17 = vld [vmem:[#allocation2 + $0x36] sm:$0x1]  ;;  %v731_v55 = vrot.slane %v1844_v31, 5  ;;  %v733_v40 = vrot.slane %v1846_v35, 4  ;;  %v735_v26 = vrot.slane %v1848_v47, 3  ;;  %v630_v36 = vsel %vm90_vm5, %v629_v18, %v628_v14  ;;  %1388 = vmatprep.subr.mxu1 %v1552_v0  ;;  %1378 = vmatpush3.msra.mxu0 %v1636_v12 }
  0x3e   :  { %v728_v32 = vsel %vm78_vm1, %v727_v53, %v1827_v58  ;;  %v1870_v59 = vld [vmem:[#allocation2 + $0x7] sm:$0x1]  ;;  %v1872_v56 = vld [vmem:[#allocation2 + $0xf] sm:$0x1]  ;;  %v1874_v31 = vld [vmem:[#allocation2 + $0x17] sm:$0x1]  ;;  %v632_v47 = vsel %vm93_vm6, %v631_v63, %v630_v36  ;;  %1379 = vmatprep.mubr.msk.f32.mxu0 %vm1553_vm0, %v1552_v0  ;;  %1389 = vmatpush3.msra.mxu1 %v1636_v12 }
  0x3f   :  { %2141 = vst [vmem:[#allocation31_spill] sm:$0xff] %v1874_v31  ;;  %v730_v35 = vsel %vm81_vm2, %v729_v37, %v728_v32  ;;  %v1880_v45 = vld [vmem:[#allocation2 + $0x1f] sm:$0x1]  ;;  %v1882_v62 = vld [vmem:[#allocation2 + $0x27] sm:$0x1]  ;;  %v634_v53 = vsel %vm96_vm7, %v633_v13, %v632_v47  ;;  %v833_v36 = vrot.slane %v1872_v56, 7  ;;  %1390 = vmatprep.mubr.msk.f32.mxu1 %vm1553_vm0, %v1552_v0  ;;  %1380 = vmatmul.mubr.msk.f32.vlgmr.msra.gmra.mxu0 %vm98_vm8, %v528_v51 }
  0x40   :  { %v1884_v18 = vld [vmem:[#allocation2 + $0x2f] sm:$0x1]  ;;  %v732_v14 = vsel %vm84_vm3, %v731_v55, %v730_v35  ;;  %v1891_v30 = vld [vmem:[#allocation2 + $0x37] sm:$0x1]  ;;  %v835_v32 = vrot.slane %v1874_v31, 6  ;;  %v737_v58 = vrot.slane %v1859_v17, 2  ;;  %1391 = vmatmul.mubr.msk.f32.vlgmr.msra.gmra.mxu1 %vm98_vm8, %v634_v53  ;;  %1393 = vmatprep.subr.mxu0 %v1552_v0 }
  0x41   :  { %2142 = vst [vmem:[#allocation32_spill] sm:$0xff] %v1884_v18  ;;  %2143 = vst [vmem:[#allocation33_spill] sm:$0xff] %v1891_v30  ;;  %v1898_v63 = vld [vmem:[#allocation2 + $0x3e] sm:$0x1]  ;;  %v734_v37 = vsel %vm87_vm4, %v733_v40, %v732_v14  ;;  %v837_v13 = vrot.slane %v1880_v45, 5  ;;  %v839_v35 = vrot.slane %v1882_v62, 4  ;;  %v834_v51 = vsel %vm78_vm1, %v833_v36, %v1870_v59  ;;  %1404 = vmatprep.subr.mxu1 %v1552_v0 }
  0x42   :  { %2144 = vst [vmem:[#allocation34_spill] sm:$0xff] %v1898_v63  ;;  %v736_v47 = vsel %vm90_vm5, %v735_v26, %v734_v37  ;;  %v1907_v55 = vld [vmem:[#allocation2 + $0x3f] sm:$0x1]  ;;  %v841_v31 = vrot.slane %v1884_v18, 3  ;;  %1394 = vmatpush3.msra.mxu0 %v1606_v1  ;;  %v836_v40 = vsel %vm81_vm2, %v835_v32, %v834_v51  ;;  %v843_v14 = vrot.slane %v1891_v30, 2  ;;  %1405 = vmatpush3.msra.mxu1 %v1606_v1 }
  0x43   :  { %2145 = vst [vmem:[#allocation35_spill] sm:$0xff] %v1907_v55  ;;  %1395 = vmatprep.subr.mxu0 %v1552_v0  ;;  %v739_v26 = vrot.slane %v1898_v63, 1  ;;  %v838_v53 = vsel %vm84_vm3, %v837_v13, %v836_v40  ;;  %1406 = vmatprep.subr.mxu1 %v1552_v0  ;;  %v738_v36 = vsel %vm93_vm6, %v737_v58, %v736_v47  ;;  %v845_v32 = vrot.slane %v1907_v55, 1 }
  0x44   :  { %1396 = vmatpush3.msra.mxu0 %v1608_v2  ;;  %v840_v37 = vsel %vm87_vm4, %v839_v35, %v838_v53  ;;  %1407 = vmatpush3.msra.mxu1 %v1608_v2  ;;  %vm925_vm10 = vcmask 15360   ;;  %vm927_vm11 = vcmask 23552   ;;  %vm929_vm12 = vcmask 31744  }
  0x45   :  { %1397 = vmatprep.subr.mxu0 %v1552_v0  ;;  %v842_v1 = vsel %vm90_vm5, %v841_v31, %v840_v37  ;;  %1408 = vmatprep.subr.mxu1 %v1552_v0  ;;  %v740_v58 = vsel %vm96_vm7, %v739_v26, %v738_v36  ;;  %vm931_vm13 = vcmask 39936   ;;  %vm933_vm14 = vcmask 48128  }
  0x46   :  { %1398 = vmatpush3.msra.mxu0 %v1612_v3  ;;  %v844_v13 = vsel %vm93_vm6, %v843_v14, %v842_v1  ;;  %1409 = vmatpush3.msra.mxu1 %v1612_v3  ;;  %v1277_v3 = vld [vmem:[%s2098_s2] ss:$0 sm:$0xff]  ;;  %vm935_vm15 = vcmask 56320   ;;  %s1562_s2 = smov [#allocation8]  }
  0x47   :  { %1399 = vmatprep.subr.mxu0 %v1552_v0  ;;  %1410 = vmatprep.subr.mxu1 %v1552_v0  ;;  %v846_v2 = vsel %vm96_vm7, %v845_v32, %v844_v13  ;;  %v1279_v32 = vld [vmem:[%s2099_s3] ss:$0 sm:$0xff]  ;;  %s1263_s3 = sshll.u32 %s1562_s2, 4  ;;  %s1264_s3 = int_to_ptr.vmem [resolvable:$true] %s1263_s3 }
  0x48   :  { %1400 = vmatpush3.msra.mxu0 %v1636_v12  ;;  %1401 = vmatprep.mubr.msk.f32.mxu0 %vm1553_vm0, %v1552_v0  ;;  %s1500_s7 = scalar_lea.vmem %s1264_s3, 128  ;;  %p1505_p11 = scmp.lt.s32.totalorder %s1264_s3, %s1264_s3 }
  0x49   :  { %1411 = vmatpush3.msra.mxu1 %v1636_v12  ;;  %1412 = vmatprep.mubr.msk.f32.mxu1 %vm1553_vm0, %v1552_v0  ;;  %vm937_vm0 = vcmask 64512   ;;  %p1501_p10 = scmp.ne.s32.totalorder %s1264_s3, %s1500_s7  ;;  %p1506_p12 = scmp.lt.s32.totalorder %s1500_s7, %s1500_s7 }
  0x4a   :  { %1402 = vmatmul.mubr.msk.f32.vlgmr.msra.gmra.mxu0 %vm98_vm8, %v740_v58  ;;  %1413 = vmatmul.mubr.msk.f32.vlgmr.msra.gmra.mxu1 %vm98_vm8, %v846_v2 }
  0x4b   :  { %p1507_p13 = por %p1506_p12, %p1505_p11 }
  0x4d   :  { %p1508_p0 = pnand %p1507_p13, %p1501_p10 }
  0xeb   :  { %v167_v31 = vpop.f32.mrf.mxu0 }
  0xec   :  { %v168_v35 = vadd.f32 %v1277_v3, %v167_v31 }
  0xed   :  { %v1337_v47 = vpop.f32.mrf.mxu0 }
  0xee   :  { %1440 = vtanh.f32 %v168_v35 }
  0xef   :  { %v279_v51 = vpop.f32.mrf.mxu1 }
  0xf0   :  { %v280_v40 = vadd.f32 %v1277_v3, %v279_v51 }
  0xf1   :  { %v1348_v14 = vpop.f32.mrf.mxu1 }
  0xf2   :  { %1442 = vtanh.f32 %v280_v40 }
  0xf4   :  { %v385_v12 = vpop.f32.mrf.mxu0 }
  0xf5   :  { %v386_v26 = vadd.f32 %v1277_v3, %v385_v12 }
  0xf6   :  { %v1359_v53 = vpop.f32.mrf.mxu0 }
  0xf7   :  { %1444 = vtanh.f32 %v386_v26  ;;  %v491_v0 = vpop.f32.mrf.mxu1 }
  0xf8   :  { %v492_v36 = vadd.f32 %v1277_v3, %v491_v0 }
  0xf9   :  { %v1370_v37 = vpop.f32.mrf.mxu1 }
  0xfa   :  { %1446 = vtanh.f32 %v492_v36 }
  0xfb   :  { %v1441_v1 = vpop.eup %1440 }
  0xfc   :  { %v178_v13 = vmul.f32 %v1441_v1, %v1279_v32 }
  0xfe   :  { %179 = vadd.xlane.f32.xlu0 %v178_v13 }
  0xff   :  { %v1443_v58 = vpop.eup %1442  ;;  %v597_v2 = vpop.f32.mrf.mxu0 }
 0x100   :  { %v598_v31 = vadd.f32 %v1277_v3, %v597_v2  ;;  %v703_v35 = vpop.f32.mrf.mxu1  ;;  %v284_v47 = vmul.f32 %v1443_v58, %v1279_v32 }
 0x101   :  { %v704_v51 = vadd.f32 %v1277_v3, %v703_v35  ;;  %v1381_v40 = vpop.f32.mrf.mxu0 }
 0x102   :  { %1448 = vtanh.f32 %v598_v31  ;;  %v1392_v14 = vpop.f32.mrf.mxu1  ;;  %285 = vadd.xlane.f32.xlu0 %v284_v47 }
 0x103   :  { %1450 = vtanh.f32 %v704_v51 }
 0x104   :  { %v1445_v12 = vpop.eup %1444 }
 0x105   :  { %v390_v26 = vmul.f32 %v1445_v12, %v1279_v32 }
 0x107   :  { %v1447_v53 = vpop.eup %1446  ;;  %391 = vadd.xlane.f32.xlu1 %v390_v26 }
 0x108   :  { %v496_v36 = vmul.f32 %v1447_v53, %v1279_v32 }
 0x10a   :  { %v809_v0 = vpop.f32.mrf.mxu0  ;;  %v915_v37 = vpop.f32.mrf.mxu1 }
 0x10b   :  { %v810_v1 = vadd.f32 %v1277_v3, %v809_v0  ;;  %v916_v13 = vadd.f32 %v1277_v3, %v915_v37  ;;  %497 = vadd.xlane.f32.xlu1 %v496_v36 }
 0x10c   :  { %v1403_v55 = vpop.f32.mrf.mxu0  ;;  %v1414_v2 = vpop.f32.mrf.mxu1 }
 0x10d   :  { %1452 = vtanh.f32 %v810_v1 }
 0x10e   :  { %1454 = vtanh.f32 %v916_v13 }
 0x10f   :  { %v1449_v58 = vpop.eup %1448 }
 0x110   :  { %v1451_v35 = vpop.eup %1450  ;;  %v602_v31 = vmul.f32 %v1449_v58, %v1279_v32 }
 0x111   :  { %v708_v40 = vmul.f32 %v1451_v35, %v1279_v32 }
 0x112   :  { %603 = vadd.xlane.f32.xlu0 %v602_v31 }
 0x113   :  { %709 = vadd.xlane.f32.xlu1 %v708_v40 }
 0x11a   :  { %v1453_v47 = vpop.eup %1452 }
 0x11b   :  { %v1455_v51 = vpop.eup %1454  ;;  %v814_v14 = vmul.f32 %v1453_v47, %v1279_v32 }
 0x11c   :  { %v920_v12 = vmul.f32 %v1455_v51, %v1279_v32 }
 0x11d   :  { %815 = vadd.xlane.f32.xlu0 %v814_v14 }
 0x11e   :  { %921 = vadd.xlane.f32.xlu1 %v920_v12 }
 0x187   :  { %v180_v26 = vpop.xlane.xlu0 %179 }
 0x18b   :  { %v286_v3 = vpop.xlane.xlu0 %285 }
 0x18c   :  { %v924_v0 = vsel %vm923_vm9, %v180_v26, %v286_v3  ;;  %v1554_v3 = vmov 1  }
 0x18d   :  { %1432 = vset.pattern.permute.xlu1 %v1554_v3 }
 0x190   :  { %v392_v53 = vpop.xlane.xlu1 %391 }
 0x191   :  { %v926_v37 = vsel %vm925_vm10, %v924_v0, %v392_v53 }
 0x194   :  { %v498_v55 = vpop.xlane.xlu1 %497 }
 0x195   :  { %v928_v1 = vsel %vm927_vm11, %v926_v37, %v498_v55  ;;  %v1555_v55 = vmov 0  }
 0x196   :  { %1431 = vset.pattern.permute.xlu0 %v1555_v55 }
 0x19b   :  { %v604_v36 = vpop.xlane.xlu0 %603 }
 0x19c   :  { %v930_v13 = vsel %vm929_vm12, %v928_v1, %v604_v36  ;;  %v710_v2 = vpop.xlane.xlu1 %709  ;;  %v1556_v1 = vmov 2  }
 0x19d   :  { %v932_v32 = vsel %vm931_vm13, %v930_v13, %v710_v2  ;;  %v1557_v13 = vmov 7   ;;  %v1558_v2 = vmov 3  }
 0x1a6   :  { %v816_v58 = vpop.xlane.xlu0 %815 }
 0x1a7   :  { %v934_v35 = vsel %vm933_vm14, %v932_v32, %v816_v58  ;;  %v922_v31 = vpop.xlane.xlu1 %921  ;;  %v1559_v32 = vmov 4   ;;  %v1560_v58 = vmov 5  }
 0x1a8   :  { %v936_v40 = vsel %vm935_vm15, %v934_v35, %v922_v31  ;;  %v1561_v35 = vmov 6  }
 0x1a9   :  { %v938_v47 = vsel %vm937_vm0, %v936_v40, -inf }
 0x1aa   :  { %939 = vmax.xlane.f32.xlu0 %v938_v47 }
 0x233   :  { %v940_v51 = vpop.xlane.xlu0 %939 }
 0x234   :  { %v941_v14 = vsub.f32 %v936_v40, %v940_v51 }
 0x236   :  { %v942_v12 = vmul.f32 1.442695, %v941_v14 }
 0x238   :  { %1456 = vpow2.f32 %v942_v12 }
 0x245   :  { %v1457_v26 = vpop.eup %1456 }
 0x246   :  { %v944_v53 = vsel %vm937_vm0, %v1457_v26, 0.0 }
 0x247   :  { %945 = vadd.xlane.f32.xlu1 %v944_v53 }
 0x2d0   :  { %v946_v0 = vpop.xlane.xlu1 %945 }
 0x2d1   :  { %1458 = vrcp.f32 %v946_v0 }
 0x2de   :  { %v1459_v36 = vpop.eup %1458 }
 0x2df   :  { %v948_v37 = vmul.f32 %v1459_v36, %v1457_v26 }
 0x2e1   :  { %1246 = vst.msk [vmem:[#allocation8] sm:$0xff] %vm937_vm0, %v948_v37  ;;  %985 = vperm.xlu1 %1432, %v948_v37   ;;  %951 = vperm.xlu0 %1431, %v948_v37  }
 0x2e5   :  { %1433 = vset.pattern.permute.xlu1 %v1556_v1  ;;  %1439 = vset.pattern.permute.xlu0 %v1557_v13 }
 0x2e6   :  { %1019 = vperm.xlu1 %1433, %v948_v37  }
 0x2ea   :  { %1434 = vset.pattern.permute.xlu1 %v1558_v2 }
 0x2eb   :  { %1053 = vperm.xlu1 %1434, %v948_v37  }
 0x2ef   :  { %1435 = vset.pattern.permute.xlu1 %v1559_v32 }
 0x2f0   :  { %1087 = vperm.xlu1 %1435, %v948_v37  }
 0x2f4   :  { %1436 = vset.pattern.permute.xlu1 %v1560_v58 }
 0x2f5   :  { %1121 = vperm.xlu1 %1436, %v948_v37  }
 0x2f9   :  { %1437 = vset.pattern.permute.xlu1 %v1561_v35 }
 0x2fa   :  { %1155 = vperm.xlu1 %1437, %v948_v37  }
 0x2fe   :  { %1438 = vset.pattern.permute.xlu1 %v1557_v13 }
 0x2ff   :  { %1189 = vperm.xlu1 %1438, %v948_v37  }
 0x300   :  { %1511 = shalt.err (!%p1508_p0)
}
 0x301   :  { %1266 = dma.vmem_to_hbm [thread:$0]  %s1264_s3, 128, %s2101_s5, [#allocation9]  }
 0x302   :  { %s1563_s5 = smov [#allocation7]  }
 0x303   :  { %s1253_s10 = sshll.u32 %s1563_s5, 4  ;;  %s1254_s10 = int_to_ptr.vmem [resolvable:$true] %s1253_s10 }
 0x304   :  { %s1520_s11 = scalar_lea.vmem %s1254_s10, 128  ;;  %p1525_p2 = scmp.lt.s32.totalorder %s1254_s10, %s1254_s10 }
 0x305   :  { %p1521_p1 = scmp.ne.s32.totalorder %s1254_s10, %s1520_s11  ;;  %p1526_p3 = scmp.lt.s32.totalorder %s1520_s11, %s1520_s11 }
 0x307   :  { %p1527_p4 = por %p1526_p3, %p1525_p2 }
 0x309   :  { %p1528_p5 = pnand %p1527_p4, %p1521_p1 }
 0x35c   :  { %v986_v31 = vpop.permute.xlu1 %985  ;;  %v952_v12 = vpop.permute.xlu0 %951 }
 0x35d   :  { %v987_v40 = vrot.slane %v986_v31, 1  ;;  %v988_v47 = vrot.slane %v986_v31, 2  ;;  %v989_v51 = vrot.slane %v986_v31, 3  ;;  %v990_v14 = vrot.slane %v986_v31, 4 }
 0x35e   :  { %v991_v26 = vrot.slane %v986_v31, 5  ;;  %v992_v53 = vrot.slane %v986_v31, 6  ;;  %v993_v3 = vrot.slane %v986_v31, 7  ;;  %v1002_v55 = vmul.f32 %v986_v31, %v1647_v20 }
 0x35f   :  { %v1003_v0 = vmul.f32 %v987_v40, %v1649_v21  ;;  %v1004_v36 = vmul.f32 %v988_v47, %v1655_v23  ;;  %v1005_v37 = vmul.f32 %v989_v51, %v1657_v24  ;;  %v1006_v1 = vmul.f32 %v990_v14, %v1659_v25 }
 0x360   :  { %v1007_v13 = vmul.f32 %v991_v26, %v1664_v27  ;;  %v1008_v2 = vmul.f32 %v992_v53, %v1666_v28  ;;  %v1009_v32 = vmul.f32 %v993_v3, %v1668_v29  ;;  %v953_v58 = vrot.slane %v952_v12, 1 }
 0x361   :  { %v954_v35 = vrot.slane %v952_v12, 2  ;;  %v955_v30 = vrot.slane %v952_v12, 3  ;;  %v956_v18 = vrot.slane %v952_v12, 4  ;;  %v957_v63 = vrot.slane %v952_v12, 5  ;;  %v1964_v20 = vpop.permute.xlu1 %1019 }
 0x362   :  { %v958_v21 = vrot.slane %v952_v12, 6  ;;  %v959_v31 = vrot.slane %v952_v12, 7  ;;  %v968_v23 = vmul.f32 %v952_v12, %v1614_v4  ;;  %v969_v24 = vmul.f32 %v953_v58, %v1616_v5 }
 0x363   :  { %v970_v25 = vmul.f32 %v954_v35, %v1620_v6  ;;  %v971_v27 = vmul.f32 %v955_v30, %v1622_v7  ;;  %v972_v28 = vmul.f32 %v956_v18, %v1624_v8  ;;  %v973_v29 = vmul.f32 %v957_v63, %v1628_v9 }
 0x364   :  { %v974_v40 = vmul.f32 %v958_v21, %v1630_v10  ;;  %v975_v47 = vmul.f32 %v959_v31, %v1632_v11  ;;  %v1010_v51 = vadd.f32 %v1002_v55, %v968_v23  ;;  %v1011_v14 = vadd.f32 %v1003_v0, %v969_v24 }
 0x365   :  { %v1012_v26 = vadd.f32 %v1004_v36, %v970_v25  ;;  %v1013_v53 = vadd.f32 %v1005_v37, %v971_v27  ;;  %v1014_v3 = vadd.f32 %v1006_v1, %v972_v28  ;;  %v1974_v4 = vadd.f32 %v1007_v13, %v973_v29 }
 0x366   :  { %v1976_v5 = vadd.f32 %v1008_v2, %v974_v40  ;;  %v1978_v6 = vadd.f32 %v1009_v32, %v975_v47  ;;  %v1021_v7 = vrot.slane %v1964_v20, 1  ;;  %v1022_v8 = vrot.slane %v1964_v20, 2  ;;  %v1982_v9 = vpop.permute.xlu1 %1053 }
 0x367   :  { %v1023_v10 = vrot.slane %v1964_v20, 3  ;;  %v1024_v11 = vrot.slane %v1964_v20, 4  ;;  %v1025_v30 = vrot.slane %v1964_v20, 5  ;;  %v1026_v18 = vrot.slane %v1964_v20, 6 }
 0x368   :  { %v1027_v63 = vrot.slane %v1964_v20, 7  ;;  %v1036_v12 = vmul.f32 %v1964_v20, %v1676_v34  ;;  %v1037_v55 = vmul.f32 %v1021_v7, %v1682_v39  ;;  %v1038_v0 = vmul.f32 %v1022_v8, %v1688_v43 }
 0x369   :  { %v1039_v36 = vmul.f32 %v1023_v10, %v1690_v44  ;;  %v1040_v37 = vmul.f32 %v1024_v11, %v1695_v48  ;;  %v1041_v1 = vmul.f32 %v1025_v30, %v1697_v49  ;;  %v1997_v13 = vmul.f32 %v1026_v18, %v1699_v50 }
 0x36a   :  { %v1044_v2 = vadd.f32 %v1036_v12, %v1010_v51  ;;  %v1045_v32 = vadd.f32 %v1037_v55, %v1011_v14  ;;  %v1046_v58 = vadd.f32 %v1038_v0, %v1012_v26  ;;  %v1055_v35 = vrot.slane %v1982_v9, 1 }
 0x36b   :  { %v1047_v21 = vadd.f32 %v1039_v36, %v1013_v53  ;;  %v2000_v34 = vadd.f32 %v1040_v37, %v1014_v3  ;;  %v1056_v39 = vrot.slane %v1982_v9, 2  ;;  %v1057_v43 = vrot.slane %v1982_v9, 3  ;;  %v2004_v44 = vpop.permute.xlu1 %1087 }
 0x36c   :  { %v1058_v48 = vrot.slane %v1982_v9, 4  ;;  %v1059_v49 = vrot.slane %v1982_v9, 5  ;;  %v1060_v50 = vrot.slane %v1982_v9, 6  ;;  %v1061_v20 = vrot.slane %v1982_v9, 7 }
 0x36d   :  { %v1070_v31 = vmul.f32 %v1982_v9, %v1713_v60  ;;  %v1071_v23 = vmul.f32 %v1055_v35, %v1715_v61  ;;  %v1072_v24 = vmul.f32 %v1056_v39, %v1724_v15  ;;  %v1073_v25 = vmul.f32 %v1057_v43, %v1726_v16  ;;  %v2148_v43 = vld [vmem:[#allocation25_spill] sm:$0xff] }
 0x36e   :  { %v1074_v27 = vmul.f32 %v1058_v48, %v1731_v19  ;;  %v1075_v28 = vmul.f32 %v1059_v49, %v1733_v22  ;;  %v1089_v29 = vrot.slane %v2004_v44, 1  ;;  %v1090_v40 = vrot.slane %v2004_v44, 2 }
 0x36f   :  { %v1078_v47 = vadd.f32 %v1070_v31, %v1044_v2  ;;  %v1079_v51 = vadd.f32 %v1071_v23, %v1045_v32  ;;  %v1080_v14 = vadd.f32 %v1072_v24, %v1046_v58  ;;  %v1081_v26 = vadd.f32 %v1073_v25, %v1047_v21  ;;  %v2147_v2 = vld [vmem:[#allocation14_spill] sm:$0xff]  ;;  %v2150_v24 = vld [vmem:[#allocation27_spill] sm:$0xff]  ;;  %v2151_v25 = vld [vmem:[#allocation28_spill] sm:$0xff] }
 0x370   :  { %v1091_v60 = vrot.slane %v2004_v44, 3  ;;  %v1092_v61 = vrot.slane %v2004_v44, 4  ;;  %v1093_v15 = vrot.slane %v2004_v44, 5  ;;  %v1094_v16 = vrot.slane %v2004_v44, 6  ;;  %v2023_v53 = vpop.permute.xlu1 %1121  ;;  %v2149_v31 = vld [vmem:[#allocation26_spill] sm:$0xff] }
 0x371   :  { %v1104_v19 = vmul.f32 %v2004_v44, %v1750_v41  ;;  %v1105_v22 = vmul.f32 %v1089_v29, %v1752_v42  ;;  %v1106_v3 = vmul.f32 %v1090_v40, %v1761_v52  ;;  %v1123_v7 = vrot.slane %v2023_v53, 1 }
 0x372   :  { %v1107_v8 = vmul.f32 %v1091_v60, %v1763_v54  ;;  %v1108_v9 = vmul.f32 %v1092_v61, %v1769_v57  ;;  %v1124_v10 = vrot.slane %v2023_v53, 2  ;;  %v1125_v11 = vrot.slane %v2023_v53, 3  ;;  %v2146_v57 = vld [vmem:[#allocation20_spill] sm:$0xff] }
 0x373   :  { %v1112_v30 = vadd.f32 %v1104_v19, %v1078_v47  ;;  %v1113_v18 = vadd.f32 %v1105_v22, %v1079_v51  ;;  %v1114_v12 = vadd.f32 %v1106_v3, %v1080_v14  ;;  %v1126_v55 = vrot.slane %v2023_v53, 4  ;;  %v2152_v47 = vld [vmem:[#allocation15_spill] sm:$0xff]  ;;  %v2153_v14 = vld [vmem:[#allocation16_spill] sm:$0xff] }
 0x374   :  { %v1115_v41 = vadd.f32 %v1107_v8, %v1081_v26  ;;  %v1127_v42 = vrot.slane %v2023_v53, 5  ;;  %v1138_v52 = vmul.f32 %v2023_v53, %v1789_v33  ;;  %v1139_v0 = vmul.f32 %v1123_v7, %v1798_v38 }
 0x375   :  { %v1140_v54 = vmul.f32 %v1124_v10, %v1800_v46  ;;  %v1141_v36 = vmul.f32 %v1125_v11, %v2146_v57  ;;  %v2041_v37 = vpop.permute.xlu1 %1155  ;;  %v1043_v32 = vmul.f32 %v1027_v63, %v2147_v2  ;;  %v1049_v58 = vadd.f32 %v1041_v1, %v1974_v4 }
 0x376   :  { %v1157_v35 = vrot.slane %v2041_v37, 1  ;;  %v1158_v21 = vrot.slane %v2041_v37, 2  ;;  %v1159_v39 = vrot.slane %v2041_v37, 3  ;;  %v1160_v33 = vrot.slane %v2041_v37, 4 }
 0x377   :  { %v1172_v38 = vmul.f32 %v2041_v37, %v2148_v43  ;;  %v1146_v46 = vadd.f32 %v1138_v52, %v1112_v30  ;;  %v1147_v48 = vadd.f32 %v1139_v0, %v1113_v18  ;;  %v1148_v49 = vadd.f32 %v1140_v54, %v1114_v12  ;;  %v2156_v54 = vld [vmem:[#allocation18_spill] sm:$0xff] }
 0x378   :  { %v1173_v23 = vmul.f32 %v1157_v35, %v2149_v31  ;;  %v1174_v63 = vmul.f32 %v1158_v21, %v2150_v24  ;;  %v1175_v4 = vmul.f32 %v1159_v39, %v2151_v25  ;;  %v1050_v1 = vadd.f32 %v1997_v13, %v1976_v5  ;;  %v2157_v35 = vld [vmem:[#allocation19_spill] sm:$0xff] }
 0x379   :  { %v1180_v29 = vadd.f32 %v1172_v38, %v1146_v46  ;;  %v1051_v40 = vadd.f32 %v1043_v32, %v1978_v6  ;;  %v1076_v51 = vmul.f32 %v1060_v50, %v2152_v47  ;;  %v1077_v26 = vmul.f32 %v1061_v20, %v2153_v14  ;;  %v2154_v50 = vld [vmem:[#allocation31_spill] sm:$0xff]  ;;  %v2159_v46 = vld [vmem:[#allocation22_spill] sm:$0xff] }
 0x37a   :  { %v1190_v60 = vpop.permute.xlu1 %1189  ;;  %v1181_v61 = vadd.f32 %v1173_v23, %v1147_v48  ;;  %v1182_v19 = vadd.f32 %v1174_v63, %v1148_v49  ;;  %v1082_v22 = vadd.f32 %v1074_v27, %v2000_v34  ;;  %v1083_v3 = vadd.f32 %v1075_v28, %v1049_v58  ;;  %v2155_v27 = vld [vmem:[#allocation17_spill] sm:$0xff]  ;;  %v2160_v48 = vld [vmem:[#allocation23_spill] sm:$0xff]  ;;  %v2163_v47 = vld [vmem:[#allocation30_spill] sm:$0xff] }
 0x37b   :  { %v1191_v7 = vrot.slane %v1190_v60, 1  ;;  %v1192_v8 = vrot.slane %v1190_v60, 2  ;;  %v1193_v10 = vrot.slane %v1190_v60, 3  ;;  %v1194_v11 = vrot.slane %v1190_v60, 4 }
 0x37c   :  { %v1195_v30 = vrot.slane %v1190_v60, 5  ;;  %v1206_v5 = vmul.f32 %v1190_v60, %v1870_v59  ;;  %v1084_v13 = vadd.f32 %v1076_v51, %v1050_v1  ;;  %v1085_v18 = vadd.f32 %v1077_v26, %v1051_v40  ;;  %v2162_v40 = vld [vmem:[#allocation29_spill] sm:$0xff] }
 0x37d   :  { %v1207_v6 = vmul.f32 %v1191_v7, %v1872_v56  ;;  %v1208_v12 = vmul.f32 %v1192_v8, %v2154_v50  ;;  %v1209_v20 = vmul.f32 %v1193_v10, %v1880_v45  ;;  %v1210_v52 = vmul.f32 %v1194_v11, %v1882_v62  ;;  %v2158_v62 = vld [vmem:[#allocation21_spill] sm:$0xff] }
 0x37e   :  { %v1214_v0 = vadd.f32 %v1206_v5, %v1180_v29  ;;  %v1095_v34 = vrot.slane %v2004_v44, 7  ;;  %v1109_v28 = vmul.f32 %v1093_v15, %v2155_v27  ;;  %v1110_v57 = vmul.f32 %v1094_v16, %v2156_v54  ;;  %v2161_v16 = vld [vmem:[#allocation24_spill] sm:$0xff]  ;;  %v2166_v10 = vld [vmem:[#allocation33_spill] sm:$0xff]  ;;  %v2167_v5 = vld [vmem:[#allocation35_spill] sm:$0xff] }
 0x37f   :  { %v1215_v2 = vadd.f32 %v1207_v6, %v1181_v61  ;;  %v1216_v32 = vadd.f32 %v1208_v12, %v1182_v19  ;;  %v1116_v59 = vadd.f32 %v1108_v9, %v1082_v22  ;;  %v1128_v58 = vrot.slane %v2023_v53, 6 }
 0x380   :  { %v1111_v56 = vmul.f32 %v1095_v34, %v2157_v35  ;;  %v1117_v21 = vadd.f32 %v1109_v28, %v1083_v3  ;;  %v1118_v39 = vadd.f32 %v1110_v57, %v1084_v13  ;;  %v1129_v45 = vrot.slane %v2023_v53, 7  ;;  %v2165_v3 = vld [vmem:[#allocation32_spill] sm:$0xff] }
 0x381   :  { %v1230_v43 = vrot.slane %v1215_v2, 7  ;;  %v1142_v38 = vmul.f32 %v1126_v55, %v2158_v62  ;;  %v1143_v44 = vmul.f32 %v1127_v42, %v2159_v46  ;;  %v1144_v15 = vmul.f32 %v1128_v58, %v2160_v48 }
 0x382   :  { %v1119_v49 = vadd.f32 %v1111_v56, %v1085_v18  ;;  %v1145_v31 = vmul.f32 %v1129_v45, %v2161_v16  ;;  %v1149_v23 = vadd.f32 %v1141_v36, %v1115_v41  ;;  %v1161_v9 = vrot.slane %v2041_v37, 5  ;;  %v2164_v41 = vld [vmem:[#allocation34_spill] sm:$0xff] }
 0x383   :  { %v1150_v24 = vadd.f32 %v1142_v38, %v1116_v59  ;;  %v1151_v63 = vadd.f32 %v1143_v44, %v1117_v21  ;;  %v1152_v25 = vadd.f32 %v1144_v15, %v1118_v39  ;;  %v1162_v1 = vrot.slane %v2041_v37, 6 }
 0x384   :  { %v1153_v29 = vadd.f32 %v1145_v31, %v1119_v49  ;;  %v1163_v53 = vrot.slane %v2041_v37, 7  ;;  %v1176_v55 = vmul.f32 %v1160_v33, %v2162_v40  ;;  %v1177_v42 = vmul.f32 %v1161_v9, %v2163_v47 }
 0x385   :  { %v1178_v51 = vmul.f32 %v1162_v1, %v1859_v17  ;;  %v1183_v14 = vadd.f32 %v1175_v4, %v1149_v23  ;;  %v1196_v26 = vrot.slane %v1190_v60, 6  ;;  %v1197_v61 = vrot.slane %v1190_v60, 7 }
 0x386   :  { %v1179_v36 = vmul.f32 %v1163_v53, %v2164_v41  ;;  %v1184_v19 = vadd.f32 %v1176_v55, %v1150_v24  ;;  %v1185_v22 = vadd.f32 %v1177_v42, %v1151_v63  ;;  %v1211_v7 = vmul.f32 %v1195_v30, %v2165_v3 }
 0x387   :  { %v1186_v8 = vadd.f32 %v1178_v51, %v1152_v25  ;;  %v1212_v11 = vmul.f32 %v1196_v26, %v2166_v10  ;;  %v1213_v37 = vmul.f32 %v1197_v61, %v2167_v5  ;;  %v1217_v13 = vadd.f32 %v1209_v20, %v1183_v14 }
 0x388   :  { %v1187_v33 = vadd.f32 %v1179_v36, %v1153_v29  ;;  %v1218_v18 = vadd.f32 %v1210_v52, %v1184_v19  ;;  %v1219_v6 = vadd.f32 %v1211_v7, %v1185_v22  ;;  %v1231_v17 = vsel %vm78_vm1, %v1230_v43, %v1214_v0 }
 0x389   :  { %v1220_v4 = vadd.f32 %v1212_v11, %v1186_v8  ;;  %v1232_v50 = vrot.slane %v1216_v32, 6  ;;  %v1234_v12 = vrot.slane %v1217_v13, 5 }
 0x38a   :  { %v1221_v60 = vadd.f32 %v1213_v37, %v1187_v33  ;;  %v1236_v27 = vrot.slane %v1218_v18, 4  ;;  %v1238_v28 = vrot.slane %v1219_v6, 3 }
 0x38b   :  { %v1233_v34 = vsel %vm81_vm2, %v1232_v50, %v1231_v17  ;;  %v1240_v20 = vrot.slane %v1220_v4, 2 }
 0x38c   :  { %v1235_v30 = vsel %vm84_vm3, %v1234_v12, %v1233_v34  ;;  %v1242_v57 = vrot.slane %v1221_v60, 1 }
 0x38d   :  { %v1237_v54 = vsel %vm87_vm4, %v1236_v27, %v1235_v30 }
 0x38e   :  { %v1239_v52 = vsel %vm90_vm5, %v1238_v28, %v1237_v54 }
 0x38f   :  { %v1241_v0 = vsel %vm93_vm6, %v1240_v20, %v1239_v52 }
 0x390   :  { %v1243_v2 = vsel %vm96_vm7, %v1242_v57, %v1241_v0 }
 0x391   :  { %1245 = vst.msk [vmem:[#allocation7] sm:$0xff] %vm98_vm8, %v1243_v2 }
 0x392   :  { %1531 = shalt.err (!%p1528_p5)
}
 0x393   :  { %1256 = dma.vmem_to_hbm [thread:$0]  %s1254_s10, 128, %s2100_s4, [#allocation4]  }
 0x394   :  { %1544 = dma.done.wait [#allocation4], 128  }
 0x395   :  { %1545 = vsyncadd [#allocation4], 4294967168 }
 0x396   :  { %1546 = dma.done.wait [#allocation9], 128  }
 0x397   :  { %1547 = vsyncadd [#allocation9], 4294967168 }
 0x398   :  { %1273 = vsyncpa [#allocation3], 1 }
 0x399   :  { %1274 = vsyncpa [#allocation6], 1 }
 0x39a   :  { %1275 = vsyncpa [#allocation4], 1 }
 0x39b   :  { %1276 = vsyncpa [#allocation9], 1 }

</bundles_post_ra>
